<compile_context>
chip_gen: v5e
topology: v5e:2x2
jax: 0.10.0
libtpu: 0.0.40
codegen_flags: <defaults>
</compile_context>

<pallas_src>
import functools

import jax
import jax.numpy as jnp
from jax import lax
from jax.experimental import pallas as pl
from jax.experimental.pallas import tpu as pltpu


def _sdpa_kernel(q_ref, k_ref, v_ref, *refs, inv_temper, matmul_dtype,
                 approx_recip, exp_dtype, return_attn, needs_mask, lk_total, tk):
    if return_attn:
        out_ref, attn_ref, q_scr, acc_ref = refs
    else:
        out_ref, q_scr, acc_ref = refs
        attn_ref = None

    kk = pl.program_id(1)

    @pl.when(kk == 0)
    def _():
        # Q is resident across the kk loop (same block index); do the
        # 1/sqrt(d_model) scale + cast once per batch element, not per tile.
        q_scr[...] = (q_ref[...].astype(jnp.float32) * inv_temper).astype(matmul_dtype)
        acc_ref[...] = jnp.zeros_like(acc_ref)

    q = q_scr[...]
    k = k_ref[...].astype(matmul_dtype)

    # logits = q @ k^T without an explicit transpose: contract last dims.
    logits = lax.dot_general(
        q, k, (((1,), (1,)), ((), ())),
        preferred_element_type=jnp.float32)                      # (Lq, tk)

    # Softmax over dim=1 of the (B, Lq, Lk) tensor == axis 0 here (query
    # axis), exactly matching nn.Softmax(dim=1) in the reference module
    # (attn COLUMNS sum to 1, not rows).  Max/sum are per key column, so a
    # padded last tile cannot contaminate valid columns.
    m = jnp.max(logits, axis=0, keepdims=True)
    # bf16 exp on v6e/v7x fast path (bf16 EUP); f32 otherwise.
    e = jnp.exp((logits - m).astype(exp_dtype)).astype(jnp.float32)
    denom = jnp.sum(e, axis=0, keepdims=True)                    # (1, tk)
    attn = e * pl.reciprocal(denom, approx=approx_recip)

    v = v_ref[...].astype(matmul_dtype)
    if needs_mask:
        # Last K tile may be partial: zero both the attn columns and the v
        # rows past Lk so padded (unspecified) data cannot reach the PV
        # matmul.  The out-of-bounds part of the attn writeback is discarded
        # by Pallas.
        col = kk * tk + lax.broadcasted_iota(jnp.int32, (1, tk), 1)
        attn = jnp.where(col < lk_total, attn, 0.0)
        row = kk * tk + lax.broadcasted_iota(jnp.int32, (tk, 1), 0)
        v = jnp.where(row < lk_total, v, jnp.zeros_like(v))

    # Dropout(p=0.1) is identity at inference time.
    attn_mm = attn.astype(matmul_dtype)
    if attn_ref is not None:
        if attn_ref.dtype == matmul_dtype:
            attn_ref[...] = attn_mm          # reuse the single cast
        else:
            attn_ref[...] = attn.astype(attn_ref.dtype)

    # output += attn @ v, accumulated in f32 VMEM scratch across Lk tiles.
    acc_ref[...] += jnp.dot(attn_mm, v, preferred_element_type=jnp.float32)

    @pl.when(kk == pl.num_programs(1) - 1)
    def _():
        out_ref[...] = acc_ref[...].astype(out_ref.dtype)


def _tpu_defaults():
    """Generation-aware VMEM budget / tile defaults / bf16-EUP availability."""
    try:
        vmem_cap = int(pltpu.get_tpu_info().vmem_capacity_bytes)
    except Exception:
        vmem_cap = 128 * 1024 * 1024
    try:
        kind = jax.devices()[0].device_kind.lower()
    except Exception:
        kind = ""
    bf16_eup = ("v6" in kind) or ("v7" in kind)      # v5e has no bf16 EUP
    vmem_limit = vmem_cap // 2                       # 32 MiB v7x, 64 MiB v5e/v6e
    if "v7" in kind:
        vmem_limit = min(vmem_limit, 36 * 1024 * 1024)
    max_k_tile = 1024 if vmem_cap >= 100 * 1024 * 1024 else 512
    return vmem_limit, max_k_tile, bf16_eup


def _pick_k_tile(lk, max_tile):
    """K tile: largest lane-aligned divisor of Lk up to max_tile; otherwise a
    lane-aligned max_tile with a cdiv grid and a masked last tile."""
    if lk <= max_tile:
        return lk, False
    cap = max(128, (max_tile // 128) * 128)
    for t in range(cap, 127, -128):
        if lk % t == 0:
            return t, False
    return cap, True


def scaled_dot_product_attention(q, k, v, d_model, *, attn_mask=None,
                                 exact=False, return_attn=True,
                                 attn_dtype=None, max_k_tile=None,
                                 vmem_limit_bytes=None):
    """q: (B, Lq, D), k: (B, Lk, D), v: (B, Lk, Dv) -> (output, attn).

    exact=True  -> f32 MXU matmuls, f32 exp, exact reciprocal (validation).
    exact=False -> bf16 MXU matmuls (f32 accum), approx reciprocal, bf16 exp
                   on v6e/v7x, bf16 attn writeback by default (attn columns
                   then sum to 1 only to ~1e-2).
    return_attn=False skips the (B, Lq, Lk) attn materialization entirely
    (the dominant HBM stream) and returns (output, None).
    """
    assert attn_mask is None, "attn_mask not supported"  # TODO(synk): mask
    B, Lq, D = q.shape
    _, Lk, Dv = v.shape
    inv_temper = 1.0 / (float(d_model) ** 0.5)

    vmem_default, tile_default, bf16_eup = _tpu_defaults()
    if vmem_limit_bytes is None:
        vmem_limit_bytes = vmem_default
    if max_k_tile is None:
        max_k_tile = tile_default
        # Keep the double-buffered (Lq, tk) attn block well inside the budget.
        while max_k_tile > 128 and Lq * max_k_tile * 4 * 2 > vmem_limit_bytes // 4:
            max_k_tile //= 2

    matmul_dtype = jnp.float32 if exact else jnp.bfloat16
    exp_dtype = jnp.bfloat16 if (bf16_eup and not exact) else jnp.float32
    if attn_dtype is None:
        attn_dtype = q.dtype if exact else jnp.bfloat16
    attn_dtype = jnp.dtype(attn_dtype)

    tk, needs_mask = _pick_k_tile(Lk, max_k_tile)
    n_k = pl.cdiv(Lk, tk)

    kernel = functools.partial(
        _sdpa_kernel, inv_temper=inv_temper, matmul_dtype=matmul_dtype,
        approx_recip=not exact, exp_dtype=exp_dtype, return_attn=return_attn,
        needs_mask=needs_mask, lk_total=Lk, tk=tk)

    out_shape = [jax.ShapeDtypeStruct((B, Lq, Dv), q.dtype)]
    out_specs = [pl.BlockSpec((pl.Squeezed(), Lq, Dv), lambda b, kk: (b, 0, 0))]
    if return_attn:
        out_shape.append(jax.ShapeDtypeStruct((B, Lq, Lk), attn_dtype))
        out_specs.append(
            pl.BlockSpec((pl.Squeezed(), Lq, tk), lambda b, kk: (b, 0, kk)))

    q_item = jnp.dtype(q.dtype).itemsize
    bytes_accessed = q_item * B * (Lq * D + Lk * D + Lk * Dv + Lq * Dv)
    if return_attn:
        bytes_accessed += attn_dtype.itemsize * B * Lq * Lk
    cost = pl.CostEstimate(
        flops=2 * B * Lq * Lk * (D + Dv),
        transcendentals=B * Lq * Lk,
        bytes_accessed=bytes_accessed,
    )

    results = pl.pallas_call(
        kernel,
        out_shape=tuple(out_shape),
        grid_spec=pltpu.PrefetchScalarGridSpec(
            num_scalar_prefetch=0,
            grid=(B, n_k),
            in_specs=[
                pl.BlockSpec((pl.Squeezed(), Lq, D), lambda b, kk: (b, 0, 0)),
                pl.BlockSpec((pl.Squeezed(), tk, D), lambda b, kk: (b, kk, 0)),
                pl.BlockSpec((pl.Squeezed(), tk, Dv), lambda b, kk: (b, kk, 0)),
            ],
            out_specs=tuple(out_specs),
            scratch_shapes=[
                pltpu.VMEM((Lq, D), matmul_dtype),     # scaled/cast q (hoisted)
                pltpu.VMEM((Lq, Dv), jnp.float32),     # output accumulator
            ],
        ),
        compiler_params=pltpu.CompilerParams(
            dimension_semantics=("parallel", "arbitrary"),
            vmem_limit_bytes=int(vmem_limit_bytes),
        ),
        cost_estimate=cost,
    )(q, k, v)

    out = results[0]
    attn = results[1] if return_attn else None
    return out, attn


def _reference(q, k, v, d_model):
    """Plain-JAX reference matching the PyTorch forward (eval mode, no mask)."""
    temper = float(d_model) ** 0.5
    attn = jnp.einsum("bqd,bkd->bqk", q, k) / temper
    attn = jax.nn.softmax(attn, axis=1)  # dim=1 (query axis), as in the module
    out = jnp.einsum("bqk,bkd->bqd", attn, v)
    return out, attn


if __name__ == "__main__":
    key = jax.random.PRNGKey(0)
    ks = jax.random.split(key, 9)

    # --- small shapes matching the module's typical usage -------------------
    B, Lq, Lk, d_model = 2, 8, 8, 32
    q = jax.random.normal(ks[0], (B, Lq, d_model), dtype=jnp.float32)
    k = jax.random.normal(ks[1], (B, Lk, d_model), dtype=jnp.float32)
    v = jax.random.normal(ks[2], (B, Lk, d_model), dtype=jnp.float32)
    ref_out, ref_attn = _reference(q, k, v, d_model)

    # exact path (f32 MXU, f32 exp, exact reciprocal): tight tolerance
    out, attn = scaled_dot_product_attention(q, k, v, d_model, exact=True)
    out = jax.block_until_ready(out)
    attn = jax.block_until_ready(attn)
    assert jnp.allclose(out, ref_out, atol=1e-5, rtol=1e-5)
    assert jnp.allclose(attn, ref_attn, atol=1e-5, rtol=1e-5)

    # fast path (bf16 MXU, bf16 exp on v6e/v7x, approx recip, bf16 attn out)
    out_f, attn_f = scaled_dot_product_attention(q, k, v, d_model)
    out_f = jax.block_until_ready(out_f)
    attn_f = jax.block_until_ready(attn_f)
    assert jnp.allclose(out_f, ref_out, atol=3e-2, rtol=3e-2)
    assert jnp.allclose(attn_f.astype(jnp.float32), ref_attn, atol=3e-2, rtol=3e-2)

    # --- exercise the Lk-tiled accumulator path (two K tiles of 512) --------
    B2, Lq2, Lk2, d2 = 2, 64, 1024, 64
    q2 = jax.random.normal(ks[3], (B2, Lq2, d2), dtype=jnp.float32)
    k2 = jax.random.normal(ks[4], (B2, Lk2, d2), dtype=jnp.float32)
    v2 = jax.random.normal(ks[5], (B2, Lk2, d2), dtype=jnp.float32)
    ref_out2, ref_attn2 = _reference(q2, k2, v2, d2)
    out2, attn2 = scaled_dot_product_attention(q2, k2, v2, d2, exact=True,
                                               max_k_tile=512)
    out2 = jax.block_until_ready(out2)
    attn2 = jax.block_until_ready(attn2)
    assert jnp.allclose(out2, ref_out2, atol=1e-4, rtol=1e-4)
    assert jnp.allclose(attn2, ref_attn2, atol=1e-5, rtol=1e-5)

    # --- output-only path: attn never materialized (biggest HBM saving) -----
    out2b, attn_none = scaled_dot_product_attention(q2, k2, v2, d2, exact=True,
                                                    max_k_tile=512,
                                                    return_attn=False)
    out2b = jax.block_until_ready(out2b)
    assert attn_none is None
    assert jnp.allclose(out2b, ref_out2, atol=1e-4, rtol=1e-4)

    # --- exercise the masked (non-divisible Lk) cdiv path --------------------
    B3, Lq3, Lk3, d3 = 2, 64, 700, 64
    q3 = jax.random.normal(ks[6], (B3, Lq3, d3), dtype=jnp.float32)
    k3 = jax.random.normal(ks[7], (B3, Lk3, d3), dtype=jnp.float32)
    v3 = jax.random.normal(ks[8], (B3, Lk3, d3), dtype=jnp.float32)
    ref_out3, ref_attn3 = _reference(q3, k3, v3, d3)
    out3, attn3 = scaled_dot_product_attention(q3, k3, v3, d3, exact=True,
                                               max_k_tile=512)
    out3 = jax.block_until_ready(out3)
    attn3 = jax.block_until_ready(attn3)
    assert jnp.allclose(out3, ref_out3, atol=1e-4, rtol=1e-4)
    assert jnp.allclose(attn3, ref_attn3, atol=1e-5, rtol=1e-5)

    print("KERNEL_OK")
</pallas_src>

<mosaic_0001>
module attributes {stable_mosaic.version = 11 : i64} {
  func.func @_sdpa_kernel(%arg0: i32, %arg1: i32, %arg2: memref<1x8x32xf32, #tpu.memory_space<vmem>>, %arg3: memref<1x8x32xf32, #tpu.memory_space<vmem>>, %arg4: memref<1x8x32xf32, #tpu.memory_space<vmem>>, %arg5: memref<1x8x32xf32, #tpu.memory_space<vmem>>, %arg6: memref<1x8x8xf32, #tpu.memory_space<vmem>>, %arg7: memref<8x32xf32, #tpu.memory_space<vmem>>, %arg8: memref<8x32xf32, #tpu.memory_space<vmem>>) attributes {dimension_semantics = [#tpu.dimension_semantics<parallel>, #tpu.dimension_semantics<arbitrary>], iteration_bounds = array<i64: 2, 1>, scalar_prefetch = 0 : i64, scratch_operands = 2 : i64, tpu.core_type = #tpu.core_type<tc>, window_params = [{transform_indices = @transform_0, window_bounds = array<i64: 1, 8, 32>}, {transform_indices = @transform_1, window_bounds = array<i64: 1, 8, 32>}, {transform_indices = @transform_2, window_bounds = array<i64: 1, 8, 32>}, {transform_indices = @transform_3, window_bounds = array<i64: 1, 8, 32>}, {transform_indices = @transform_4, window_bounds = array<i64: 1, 8, 8>}]} {
    %c0_i32 = arith.constant 0 : i32
    %0 = arith.cmpi eq, %arg1, %c0_i32 : i32
    %1 = arith.extui %0 : i1 to i32
    %c0_i32_0 = arith.constant 0 : i32
    %2 = arith.cmpi ne, %1, %c0_i32_0 : i32
    scf.if %2 {
      %c0_20 = arith.constant 0 : index
      %c0_21 = arith.constant 0 : index
      %c0_22 = arith.constant 0 : index
      %29 = vector.load %arg2[%c0_20, %c0_21, %c0_22] : memref<1x8x32xf32, #tpu.memory_space<vmem>>, vector<1x8x32xf32>
      %30 = vector.shape_cast %29 : vector<1x8x32xf32> to vector<8x32xf32>
      %cst_23 = arith.constant 0.176776692 : f32
      %31 = vector.broadcast %cst_23 : f32 to vector<8x32xf32>
      %32 = arith.mulf %30, %31 : vector<8x32xf32>
      %c0_24 = arith.constant 0 : index
      %c0_25 = arith.constant 0 : index
      %33 = vector.load %arg7[%c0_24, %c0_25] : memref<8x32xf32, #tpu.memory_space<vmem>>, vector<8x32xf32>
      tpu.vector_store %arg7[%c0_24, %c0_25], %32 {strides = array<i32>} : memref<8x32xf32, #tpu.memory_space<vmem>>, vector<8x32xf32>,
      %cst_26 = arith.constant 0.000000e+00 : f32
      %34 = vector.broadcast %cst_26 : f32 to vector<8x32xf32>
      %c0_27 = arith.constant 0 : index
      %c0_28 = arith.constant 0 : index
      %35 = vector.load %arg8[%c0_27, %c0_28] : memref<8x32xf32, #tpu.memory_space<vmem>>, vector<8x32xf32>
      tpu.vector_store %arg8[%c0_27, %c0_28], %34 {strides = array<i32>} : memref<8x32xf32, #tpu.memory_space<vmem>>, vector<8x32xf32>,
    } else {
    }
    %c0 = arith.constant 0 : index
    %c0_1 = arith.constant 0 : index
    %3 = vector.load %arg7[%c0, %c0_1] : memref<8x32xf32, #tpu.memory_space<vmem>>, vector<8x32xf32>
    %c0_2 = arith.constant 0 : index
    %c0_3 = arith.constant 0 : index
    %c0_4 = arith.constant 0 : index
    %4 = vector.load %arg3[%c0_2, %c0_3, %c0_4] : memref<1x8x32xf32, #tpu.memory_space<vmem>>, vector<1x8x32xf32>
    %5 = vector.shape_cast %4 : vector<1x8x32xf32> to vector<8x32xf32>
    %cst = arith.constant dense<0.000000e+00> : vector<8x8xf32>
    %6 = tpu.matmul %3, %5, %cst {dimension_numbers = #tpu.dot_dimension_numbers<[1], [1], [0], [0], [0, 0, 1, 0], [], []>} : vector<8x32xf32>, vector<8x32xf32>, vector<8x8xf32> -> vector<8x8xf32>
    %cst_5 = arith.constant dense<0xFF800000> : vector<8xf32>
    %7 = vector.multi_reduction <maximumf>, %6, %cst_5 [0] : vector<8x8xf32> to vector<8xf32>
    %8 = vector.shape_cast %7 : vector<8xf32> to vector<1x8xf32>
    %9 = vector.broadcast %8 : vector<1x8xf32> to vector<8x8xf32>
    %10 = arith.subf %6, %9 : vector<8x8xf32>
    %11 = math.exp %10 : vector<8x8xf32>
    %cst_6 = arith.constant dense<0.000000e+00> : vector<8xf32>
    %12 = vector.multi_reduction <add>, %11, %cst_6 [0] : vector<8x8xf32> to vector<8xf32>
    %13 = vector.shape_cast %12 : vector<8xf32> to vector<1x8xf32>
    %14 = tpu.reciprocal %13 : vector<1x8xf32> -> vector<1x8xf32>
    %15 = vector.broadcast %14 : vector<1x8xf32> to vector<8x8xf32>
    %16 = arith.mulf %11, %15 : vector<8x8xf32>
    %c0_7 = arith.constant 0 : index
    %c0_8 = arith.constant 0 : index
    %c0_9 = arith.constant 0 : index
    %17 = vector.load %arg4[%c0_7, %c0_8, %c0_9] : memref<1x8x32xf32, #tpu.memory_space<vmem>>, vector<1x8x32xf32>
    %18 = vector.shape_cast %17 : vector<1x8x32xf32> to vector<8x32xf32>
    %c0_10 = arith.constant 0 : index
    %c0_11 = arith.constant 0 : index
    %c0_12 = arith.constant 0 : index
    %19 = vector.load %arg6[%c0_10, %c0_11, %c0_12] : memref<1x8x8xf32, #tpu.memory_space<vmem>>, vector<1x8x8xf32>
    %20 = vector.shape_cast %19 : vector<1x8x8xf32> to vector<8x8xf32>
    %21 = vector.shape_cast %16 : vector<8x8xf32> to vector<1x8x8xf32>
    tpu.vector_store %arg6[%c0_10, %c0_11, %c0_12], %21 {strides = array<i32>} : memref<1x8x8xf32, #tpu.memory_space<vmem>>, vector<1x8x8xf32>,
    %c0_13 = arith.constant 0 : index
    %c0_14 = arith.constant 0 : index
    %22 = vector.load %arg8[%c0_13, %c0_14] : memref<8x32xf32, #tpu.memory_space<vmem>>, vector<8x32xf32>
    %cst_15 = arith.constant dense<0.000000e+00> : vector<8x32xf32>
    %23 = tpu.matmul %16, %18, %cst_15 {dimension_numbers = #tpu.dot_dimension_numbers<[1], [0], [0], [1], [0, 0, 1, 1], [], []>} : vector<8x8xf32>, vector<8x32xf32>, vector<8x32xf32> -> vector<8x32xf32>
    %24 = arith.addf %22, %23 : vector<8x32xf32>
    %c0_16 = arith.constant 0 : index
    %c0_17 = arith.constant 0 : index
    %25 = vector.load %arg8[%c0_16, %c0_17] : memref<8x32xf32, #tpu.memory_space<vmem>>, vector<8x32xf32>
    tpu.vector_store %arg8[%c0_16, %c0_17], %24 {strides = array<i32>} : memref<8x32xf32, #tpu.memory_space<vmem>>, vector<8x32xf32>,
    %c0_i32_18 = arith.constant 0 : i32
    %26 = arith.cmpi eq, %arg1, %c0_i32_18 : i32
    %27 = arith.extui %26 : i1 to i32
    %c0_i32_19 = arith.constant 0 : i32
    %28 = arith.cmpi ne, %27, %c0_i32_19 : i32
    scf.if %28 {
      %c0_20 = arith.constant 0 : index
      %c0_21 = arith.constant 0 : index
      %29 = vector.load %arg8[%c0_20, %c0_21] : memref<8x32xf32, #tpu.memory_space<vmem>>, vector<8x32xf32>
      %c0_22 = arith.constant 0 : index
      %c0_23 = arith.constant 0 : index
      %c0_24 = arith.constant 0 : index
      %30 = vector.load %arg5[%c0_22, %c0_23, %c0_24] : memref<1x8x32xf32, #tpu.memory_space<vmem>>, vector<1x8x32xf32>
      %31 = vector.shape_cast %30 : vector<1x8x32xf32> to vector<8x32xf32>
      %32 = vector.shape_cast %29 : vector<8x32xf32> to vector<1x8x32xf32>
      tpu.vector_store %arg5[%c0_22, %c0_23, %c0_24], %32 {strides = array<i32>} : memref<1x8x32xf32, #tpu.memory_space<vmem>>, vector<1x8x32xf32>,
    } else {
    }
    return
  }
  func.func @transform_0(%arg0: i32, %arg1: i32) -> (i32, i32, i32) {
    %c0_i32 = arith.constant 0 : i32
    %c0_i32_0 = arith.constant 0 : i32
    %c0_i32_1 = arith.constant 0 : i32
    return %arg0, %c0_i32, %c0_i32_0 : i32, i32, i32
  }
  func.func @transform_1(%arg0: i32, %arg1: i32) -> (i32, i32, i32) {
    %c0_i32 = arith.constant 0 : i32
    %c0_i32_0 = arith.constant 0 : i32
    return %arg0, %arg1, %c0_i32 : i32, i32, i32
  }
  func.func @transform_2(%arg0: i32, %arg1: i32) -> (i32, i32, i32) {
    %c0_i32 = arith.constant 0 : i32
    %c0_i32_0 = arith.constant 0 : i32
    return %arg0, %arg1, %c0_i32 : i32, i32, i32
  }
  func.func @transform_3(%arg0: i32, %arg1: i32) -> (i32, i32, i32) {
    %c0_i32 = arith.constant 0 : i32
    %c0_i32_0 = arith.constant 0 : i32
    %c0_i32_1 = arith.constant 0 : i32
    return %arg0, %c0_i32, %c0_i32_0 : i32, i32, i32
  }
  func.func @transform_4(%arg0: i32, %arg1: i32) -> (i32, i32, i32) {
    %c0_i32 = arith.constant 0 : i32
    %c0_i32_0 = arith.constant 0 : i32
    return %arg0, %c0_i32, %arg1 : i32, i32, i32
  }
}

</mosaic_0001>

<bundles_post_ra>
// kernel: tpu_custom_call.1
= control target key start
LH: loop header
LB: loop body
LE: loop exit
PB: predicated region body
PF: predicated region fallthrough
CT: control target
= control target key end

     0   :  { %s1144_s0 = inlined_call_operand.hbm [shape: f32[2,8,32], index: 0, kind: input, shape index: {}]   ;;  %s1145_s1 = inlined_call_operand.hbm [shape: f32[2,8,32], index: 1, kind: input, shape index: {}]   ;;  %s1146_s2 = inlined_call_operand.hbm [shape: f32[2,8,32], index: 2, kind: input, shape index: {}]   ;;  %s1147_s3 = inlined_call_operand.hbm [shape: f32[2,8,32], index: 3, kind: output, shape index: {0}]   ;;  %s1148_s4 = inlined_call_operand.hbm [shape: f32[2,8,8], index: 4, kind: output, shape index: {1}]  }
   0x1   :  { %1152 = sst [smem:[#allocation21_spill]] %s1145_s1 }
   0x2   :  { %10 = vsyncpa [#allocation5], 0 }
   0x3   :  { %12 = vsyncpa [#allocation5 + $0x1], 0 }
   0x4   :  { %13 = vsyncpa [#allocation8], 0 }
   0x5   :  { %15 = vsyncpa [#allocation8 + $0x1], 0 }
   0x6   :  { %16 = vsyncpa [#allocation6], 0 }
   0x7   :  { %18 = vsyncpa [#allocation6 + $0x1], 0 }
   0x8   :  { %19 = vsyncpa [#allocation12], 0 }
   0x9   :  { %21 = vsyncpa [#allocation12 + $0x1], 0  ;;  %s961_s15 = smov 0   ;;  %s963_s16 = smov 0  }
   0xa   :  { %s965_s17 = smov 0   ;;  %s967_s18 = smov 0  }
   0xb   :  { %s969_s19 = smov 0   ;;  %s971_s20 = smov 0  }
   0xc LB: > { %1153 = sst [smem:[#allocation17_spill]] %s921_s17  ;;  %s992_s21 = sadd.s32 4294967295, %s933_s20   ;;  %s933_s20 = sphi %s971_s20, %s27_s20   ;;  %s929_s19 = sphi %s969_s19, %s1167_s19   ;;  %s925_s18 = sphi %s967_s18, %s1166_s18   ;;  %s921_s17 = sphi %s965_s17, %s1165_s17   ;;  %s917_s16 = sphi %s963_s16, %s1169_s16   ;;  %s913_s15 = sphi %s961_s15, %s1168_s15  }
   0xd   : > { %1154 = sst [smem:[#allocation18_spill]] %s929_s19  ;;  %s619_s22 = sadd.s32 4294967294, %s933_s20  }
   0xe   : > { %s39_s23 = sadd.s32 1, %s929_s19  ;;  %s46_s24 = sadd.s32 1, %s921_s17 }
   0xf   : > { %p41_p0 = scmp.ge.s32.totalorder %s39_s23, 2  ;;  %p53_p1 = scmp.ne.s32.totalorder %s921_s17, %s917_s16 }
  0x10   : > { %p54_p2 = scmp.eq.s32.totalorder %s933_s20, 0  ;;  %p59_p3 = scmp.ne.s32.totalorder %s917_s16, %s913_s15 }
  0x11   : > { %s1171_s23 = smov (%p41_p0, %s39_s23), 0  ;;  %p60_p5 = scmp.eq.s32.totalorder %s992_s21, 0 }
  0x12   : > { %1155 = sst [smem:[#allocation19_spill]] %s1171_s23  ;;  %p1004_p4 = por %p54_p2, %p53_p1 }
  0x13   : > { %s43_s26 = ssub.s32 %s929_s19, %s1171_s23  ;;  %p139_p6 = scmp.eq.s32.totalorder %s992_s21, 1 }
  0x14   : > { %p44_p7 = scmp.eq.s32.totalorder %s43_s26, 0  ;;  %p1012_p8 = por %p60_p5, %p59_p3 }
  0x15   : > { %p1016_p9 = por %p139_p6, %p53_p1  ;;  %p145_p10 = scmp.eq.s32.totalorder %s619_s22, 1 }
  0x16   : > { %s1021_s29 = scalar_select %p44_p7, %s921_s17, %s46_s24  }
  0x17   : > { %p1023_p11 = por %p145_p10, %p59_p3  ;;  %p621_p12 = scmp.ge.s32.totalorder %s933_s20, 2 }
  0x18   : > { %1159 = sst [smem:[#allocation20_spill]] %s1021_s29  ;;  %p670_p13 = scmp.lt.s32.totalorder %s933_s20, 2 }
  0x19   : > { %s193_s5 = sand.u32 1, %s921_s17   ;;  %s623_s7 = sshll.u32 %s929_s19, 3 }
  0x1a   : > { %s622_s6 = sshll.u32 %s193_s5, 3  ;;  %p1033_p0 = pnand %p670_p13, %p1004_p4 }
  0x1b   : > { %s212_s9 = sand.u32 1, %s933_s20   ;;  %s1162_s1 = sld [smem:[#allocation21_spill]] }
  0x1c   : > { %s216_s14 = scalar_lea.vmem [#allocation7], %s622_s6  ;;  %s213_s24 = scalar_lea.sflag [#allocation8], %s212_s9 }
  0x1d   : > { %s225_s22 = sshll.u32 %s216_s14, 4  ;;  %p628_p1 = scmp.ge.s32.totalorder %s933_s20, 1  ;;  %s226_s22 = int_to_ptr.vmem [resolvable:$true] %s225_s22 }
  0x1e   : > { %p250_p2 = scmp.lt.s32.totalorder %s933_s20, 3  ;;  %s201_s10 = scalar_lea.hbm %s1144_s0, %s623_s7 }
  0x1f   : > { %s203_s11 = sshll.u32 %s201_s10, 4  ;;  %s194_s14 = scalar_lea.sflag [#allocation5], %s193_s5  ;;  %s204_s11 = int_to_ptr.hbm [resolvable:$true] %s203_s11 }
  0x20   : > { %p1045_p3 = pnand %p628_p1, %p250_p2  ;;  %s236_s29 = scalar_lea.vmem [#allocation9], %s622_s6 }
  0x21   : > { %s221_s12 = scalar_lea.hbm %s1162_s1, %s623_s7  ;;  %s245_s17 = sshll.u32 %s236_s29, 4  ;;  %s246_s17 = int_to_ptr.vmem [resolvable:$true] %s245_s17 }
  0x22   : > { %s223_s13 = sshll.u32 %s221_s12, 4  ;;  %s197_s12 = scalar_lea.vmem [#allocation4], %s622_s6  ;;  %s224_s13 = int_to_ptr.hbm [resolvable:$true] %s223_s13 }
  0x23   : > { %659 = dma.hbm_to_vmem [thread:$0]  (!%p1033_p0), %s224_s13, 128, %s226_s22, %s213_s24  }
  0x24   : > { %s205_s1 = sshll.u32 %s197_s12, 4  ;;  %s241_s22 = scalar_lea.hbm %s1146_s2, %s623_s7  ;;  %s206_s1 = int_to_ptr.vmem [resolvable:$true] %s205_s1 }
  0x25   : > { %656 = dma.hbm_to_vmem [thread:$0]  (!%p1033_p0), %s204_s11, 128, %s206_s1, %s194_s14  }
  0x26   : > { %s243_s19 = sshll.u32 %s241_s22, 4  ;;  %254 = sbr.rel (%p1045_p3) target bundleno = 379 (0x17b), region = 32  ;;  %s244_s19 = int_to_ptr.hbm [resolvable:$true] %s243_s19 }
  0x27   : > { %662 = dma.hbm_to_vmem [thread:$0]  (!%p1033_p0), %s244_s19, 128, %s246_s17, %s213_s24  }
  0x28   : > { %s1062_s23 = sand.u32 (!%p1045_p3), 1, %s917_s16  }
  0x29   : > { %s1065_s1 = sshll.u32 (!%p1045_p3), %s1062_s23, 3  ;;  %s257_s5 = scalar_lea.sflag (!%p1045_p3), [#allocation5], %s1062_s23 }
  0x2a   : > { %s260_s7 = scalar_lea.vmem (!%p1045_p3), [#allocation4], %s1065_s1 }
  0x2b   : > { %896 = dma.done.wait (%p1012_p8), %s257_s5, 128  }
  0x2c   : > { %898 = vsyncadd (%p1012_p8), %s257_s5, 4294967168  ;;  %s266_s17 = sand.u32 1, %s992_s21   ;;  %s270_s29 = scalar_lea.vmem [#allocation7], %s1065_s1 }
  0x2d   : > { %s267_s19 = scalar_lea.sflag [#allocation8], %s266_s17 }
  0x2e   : > { %900 = dma.done.wait (%p1012_p8), %s267_s19, 256  }
  0x2f   : > { %902 = vsyncadd (%p1012_p8), %s267_s19, 4294967040  ;;  %v325_v0 = vld [vmem:[%s260_s7] sm:$0xff]  ;;  %vm327_vm0 = vcmask 261120   ;;  %v331_v1 = vld [vmem:[%s270_s29] sm:$0xff]  ;;  %vm359_vm1 = vcmask 64512   ;;  %s280_s21 = scalar_lea.vmem [#allocation9], %s1065_s1 }
  0x30   : > { %v326_v2 = vmul.f32 0.17677669, %v325_v0  ;;  %634 = vmatpush.xpose.msk.msra.mxu0 %vm327_vm0, %v331_v1  ;;  %v392_v9 = vld [vmem:[%s280_s21] sm:$0xff]  ;;  %v935_v18 = vmov 0.0   ;;  %s320_s27 = scalar_lea.vmem [#allocation11], %s1065_s1  ;;  %s639_s6 = sshll.u32 %s925_s18, 3 }
  0x31   : > { %413 = vmatpush.msra.mxu1 %v392_v9  ;;  %329 = vst.msk [vmem:[#allocation3] sm:$0xff] %vm327_vm0, %v935_v18  ;;  %s456_s25 = scalar_lea.hbm %s1148_s4, %s639_s6  ;;  %s458_s26 = sshll.u32 %s320_s27, 4  ;;  %s459_s26 = int_to_ptr.vmem [resolvable:$true] %s458_s26 }
  0x32   : > { %328 = vst.msk [vmem:[#allocation2] sm:$0xff] %vm327_vm0, %v326_v2  ;;  %s460_s10 = sshll.u32 %s456_s25, 4  ;;  %s431_s11 = scalar_lea.sflag [#allocation12], %s1062_s23  ;;  %s461_s10 = int_to_ptr.hbm [resolvable:$true] %s460_s10 }
  0x33   : > { %s829_s12 = sshra.s32 %s461_s10, 4  ;;  %s835_s18 = scalar_lea.hbm %s1148_s4, 16  ;;  %s830_s12 = int_to_ptr.hbm [resolvable:$true] %s829_s12 }
  0x34   : > { %s831_s14 = scalar_lea.hbm %s830_s12, 8  ;;  %p836_p7 = scmp.lt.s32.totalorder %s830_s12, %s1148_s4 }
  0x35   : > { %p832_p4 = scmp.ne.s32.totalorder %s830_s12, %s831_s14  ;;  %p837_p8 = scmp.lt.s32.totalorder %s835_s18, %s831_s14 }
  0x37   : > { %p833_p5 = pnand %p832_p4, %p1016_p9  ;;  %p838_p10 = por %p837_p8, %p836_p7 }
  0x39   : > { %v330_v3 = vld [vmem:[#allocation2] sm:$0xff]  ;;  %p834_p6 = pneg %p833_p5 }
  0x3a   : > { %635 = vmatmul.msk.f32.vlgmr.msra.gmra.mxu0 %vm327_vm0, %v330_v3 }
  0x3b   : > { %p839_p13 = pnand %p838_p10, %p834_p6 }
  0xb7   : > { %v356_v4 = vpop.f32.mrf.mxu0 }
  0xb8   : > { %v360_v5 = vsel %vm359_vm1, %v356_v4, -inf }
  0xb9   : > { %v361_v6 = vrot.slane %v360_v5, 4 }
  0xbb   : > { %v362_v7 = vmax.f32 %v360_v5, %v361_v6 }
  0xbd   : > { %v363_v8 = vrot.slane %v362_v7, 2 }
  0xbf   : > { %v364_v10 = vmax.f32 %v362_v7, %v363_v8 }
  0xc1   : > { %v365_v11 = vrot.slane %v364_v10, 1 }
  0xc3   : > { %v366_v12 = vmax.f32 %v364_v10, %v365_v11 }
  0xc5   : > { %v367_v13 = vsub.f32 %v356_v4, %v366_v12 }
  0xc7   : > { %v368_v14 = vmul.f32 1.442695, %v367_v13 }
  0xc9   : > { %721 = vpow2.f32 %v368_v14 }
  0xcf   : > { %v722_v15 = vpop.eup %721 }
  0xd0   : > { %v370_v16 = vsel %vm359_vm1, %v722_v15, 0.0 }
  0xd1   : > { %v371_v17 = vrot.slane %v370_v16, 4 }
  0xd3   : > { %v372_v19 = vadd.f32 %v371_v17, %v370_v16 }
  0xd5   : > { %v373_v20 = vrot.slane %v372_v19, 2 }
  0xd7   : > { %v374_v21 = vadd.f32 %v373_v20, %v372_v19 }
  0xd9   : > { %v375_v22 = vrot.slane %v374_v21, 1 }
  0xdb   : > { %v376_v23 = vadd.f32 %v375_v22, %v374_v21 }
  0xdd   : > { %723 = vrcp.f32 %v376_v23  ;;  %v388_v27 = vand.u32 2147483648, %v376_v23  ;;  %v386_v29 = vand.u32 2147483647, %v376_v23  ;;  %vm382_vm3 = vweird.f32 %v376_v23 }
  0xdf   : > { %v389_v31 = vor.u32 1.1754944e-38, %v388_v27  ;;  %vm387_vm5 = vcmp.eq.f32.partialorder %v386_v29, 8.507059e+37 }
  0xe3   : > { %v724_v24 = vpop.eup %723 }
  0xe4   : > { %v378_v25 = vmul.f32 %v724_v24, %v376_v23  ;;  %vm383_vm2 = vweird.f32 %v724_v24 }
  0xe5   : > { %vm384_vm4 = vmor %vm382_vm3, %vm383_vm2 }
  0xe6   : > { %v379_v26 = vsub.f32 1.0, %v378_v25 }
  0xe8   : > { %v380_v28 = vmul.f32 %v724_v24, %v379_v26 }
  0xea   : > { %v381_v30 = vadd.f32 %v724_v24, %v380_v28 }
  0xec   : > { %v385_v32 = vsel %vm384_vm4, %v724_v24, %v381_v30 }
  0xed   : > { %v390_v33 = vsel %vm387_vm5, %v389_v31, %v385_v32 }
  0xee   : > { %v391_v34 = vmul.f32 %v722_v15, %v390_v33 }
  0xf0   : > { %636 = vmatmul.msk.f32.vlgmr.msra.gmra.mxu1 %vm359_vm1, %v391_v34  ;;  %393 = vst.msk [vmem:[%s320_s27] sm:$0xff] %vm359_vm1, %v391_v34 }
  0xf1   : > { %842 = shalt.err (!%p839_p13)
}
  0xf2   : > { %650 = dma.vmem_to_hbm [thread:$0]  (%p1016_p9), %s459_s26, 128, %s461_s10, %s431_s11   ;;  %v394_v35 = vld [vmem:[#allocation3] sm:$0xff] }
  0xf3   : > { %s441_s19 = scalar_lea.hbm %s1147_s3, %s639_s6  ;;  %s313_s29 = scalar_lea.vmem [#allocation10], %s1065_s1 }
  0xf4   : > { %s443_s21 = sshll.u32 %s313_s29, 4  ;;  %s445_s27 = sshll.u32 %s441_s19, 4  ;;  %s444_s21 = int_to_ptr.vmem [resolvable:$true] %s443_s21  ;;  %s446_s27 = int_to_ptr.hbm [resolvable:$true] %s445_s27 }
  0xf5   : > { %s426_s8 = scalar_lea.sflag [#allocation6], %s1062_s23  ;;  %s857_s24 = sshra.s32 %s446_s27, 4  ;;  %s858_s24 = int_to_ptr.hbm [resolvable:$true] %s857_s24 }
  0xf6   : > { %s859_s25 = scalar_lea.hbm %s858_s24, 8  ;;  %s863_s6 = scalar_lea.hbm %s1147_s3, 16 }
  0xf7   : > { %p860_p0 = scmp.ne.s32.totalorder %s858_s24, %s859_s25  ;;  %p864_p3 = scmp.lt.s32.totalorder %s858_s24, %s1147_s3 }
  0xf8   : > { %p865_p4 = scmp.lt.s32.totalorder %s863_s6, %s859_s25 }
  0xf9   : > { %p861_p1 = pnand %p860_p0, %p1016_p9 }
  0xfa   : > { %p866_p5 = por %p865_p4, %p864_p3 }
  0xfb   : > { %p862_p2 = pneg %p861_p1 }
  0xfd   : > { %p867_p6 = pnand %p866_p5, %p862_p2 }
 0x16d   : > { %v415_v36 = vpop.f32.mrf.mxu1 }
 0x16e   : > { %v418_v37 = vadd.f32 %v415_v36, %v394_v35 }
 0x170   : > { %419 = vst.msk [vmem:[#allocation3] sm:$0xff] %vm327_vm0, %v418_v37 }
 0x177   : > { %v423_v38 = vld [vmem:[#allocation3] sm:$0xff] }
 0x178   : > { %424 = vst.msk [vmem:[%s313_s29] sm:$0xff] %vm327_vm0, %v423_v38 }
 0x179   : > { %870 = shalt.err (!%p867_p6)
}
 0x17a   : > { %649 = dma.vmem_to_hbm [thread:$0]  (%p1016_p9), %s444_s21, 128, %s446_s27, %s426_s8  }
 0x17b PF: > { %s472_s23 = sand.u32 1, %s913_s15   ;;  %p664_p7 = pnand %p621_p12, %p1023_p11 }
 0x17c   : > { %s473_s12 = scalar_lea.sflag [#allocation6], %s472_s23 }
 0x17d   : > { %p665_p8 = pneg %p664_p7 }
 0x17f   : > { %904 = dma.done.wait (%p665_p8), %s473_s12, 128  }
 0x180   : > { %906 = vsyncadd (%p665_p8), %s473_s12, 4294967168  ;;  %s483_s14 = scalar_lea.sflag [#allocation12], %s472_s23 }
 0x181   : > { %908 = dma.done.wait (%p665_p8), %s483_s14, 128  }
 0x182   : > { %910 = vsyncadd (%p665_p8), %s483_s14, 4294967168  ;;  %s27_s20 = sadd.s32 1, %s933_s20   ;;  %s1164_s28 = sld [smem:[#allocation17_spill]] }
 0x183   : > { %p24_p10 = scmp.ge.s32.totalorder %s27_s20, 4   ;;  %s1165_s17 = sld [smem:[#allocation20_spill]] }
 0x184   : > { %s1166_s18 = sld [smem:[#allocation18_spill]]  ;;  %s1168_s15 = smov %s917_s16 }
 0x185   : > { %s1167_s19 = sld [smem:[#allocation19_spill]]  ;;  %26 = sbr.rel (!%p24_p10) target bundleno = 12 (0xc), region = 126 }
 0x188   : > { %s1169_s16 = smov %s1164_s28 }
 0x18a   :  { %489 = vsyncpa [#allocation5], 1 }
 0x18b   :  { %491 = vsyncpa [#allocation5 + $0x1], 1 }
 0x18c   :  { %492 = vsyncpa [#allocation8], 1 }
 0x18d   :  { %494 = vsyncpa [#allocation8 + $0x1], 1 }
 0x18e   :  { %495 = vsyncpa [#allocation6], 1 }
 0x18f   :  { %497 = vsyncpa [#allocation6 + $0x1], 1 }
 0x190   :  { %498 = vsyncpa [#allocation12], 1 }
 0x191   :  { %500 = vsyncpa [#allocation12 + $0x1], 1 }

</bundles_post_ra>
